<compile_context>
chip_gen: v7x
topology: tpu7x:2x2x1
jax: 0.10.0
libtpu: 0.0.40
codegen_flags: <defaults>
</compile_context>

<pallas_src>
import numpy as np

import jax
import jax.numpy as jnp
from jax.experimental import pallas as pl
from jax.experimental.pallas import tpu as pltpu


# ----------------------- wrapper-side preprocessing ------------------------ #
def _row_select(batch, h, oh, ksize, stride, pad):
    """R[kh, n*OH+oh, n*H+ih] = 1 iff ih == stride*oh + kh - pad (in range)."""
    r = np.zeros((ksize, batch * oh, batch * h), dtype=np.float32)
    for kh in range(ksize):
        for b in range(batch):
            for o in range(oh):
                ih = stride * o + kh - pad
                if 0 <= ih < h:
                    r[kh, b * oh + o, b * h + ih] = 1.0
    return r


def _col_fold(w_oihw, w_in, ow, stride, pad):
    """Nmat[kh, iw*Cin+ci, ow*Cout+co] = w[co,ci,kh,kw] for iw == stride*ow+kw-pad."""
    cout, cin, kh_sz, kw_sz = w_oihw.shape
    mask = np.zeros((kw_sz, w_in, ow), dtype=np.float32)
    for kw in range(kw_sz):
        for o in range(ow):
            iw = stride * o + kw - pad
            if 0 <= iw < w_in:
                mask[kw, iw, o] = 1.0
    wt = jnp.transpose(w_oihw.astype(jnp.float32), (2, 3, 1, 0))   # (kh,kw,ci,co)
    nm = jnp.einsum("xwv,kxio->kwivo", jnp.asarray(mask), wt)      # (kh,iw,ci,ow,co)
    return nm.reshape(kh_sz, w_in * cin, ow * cout)


# ------------------------------ Pallas kernel ------------------------------ #
def _make_disc_kernel(num_layers, acts, compute_dtype):
    """Fused whole-network kernel: a chain of small 2-D MXU matmuls in VMEM."""

    def kernel(a_ref, *refs):
        out_ref = refs[-1]
        a = a_ref[...]                                   # (N*H0, W0*C0) bf16
        z = None
        for li in range(num_layers):                     # static unroll
            r_ref = refs[2 * li]                         # (K, N*OH, N*H)
            n_ref = refs[2 * li + 1]                     # (K, W*Cin, OW*Cout)
            ksize = r_ref.shape[0]
            z = jnp.zeros((r_ref.shape[1], n_ref.shape[2]), jnp.float32)
            for kh in range(ksize):                      # static unroll (K=4)
                t = jnp.dot(a, n_ref[kh],                # kw taps + weights
                            preferred_element_type=jnp.float32)
                z = z + jnp.dot(r_ref[kh],               # vertical stride/pad gather
                                t.astype(compute_dtype),
                                preferred_element_type=jnp.float32)
            if acts[li] == "leaky":                      # LeakyReLU(0.2), f32
                z = jnp.where(z >= 0.0, z, 0.2 * z)
            elif acts[li] == "sigmoid":                  # fused trailing Sigmoid
                z = jax.nn.sigmoid(z)
            a = z.astype(compute_dtype)                  # next layer's input
        out_ref[...] = z.astype(out_ref.dtype)

    return kernel


# --------------------------------- forward --------------------------------- #
def discriminator_forward(x_nchw, weights, *, compute_dtype=jnp.bfloat16):
    """Forward pass; input/output are NCHW like the PyTorch module."""
    n, cin0, h, w = x_nchw.shape

    # Geometry implied by Discriminator.__init__ (d_fully_connected=False):
    # every conv except the last uses (k=4, s=2, p=1); the last uses (4, 1, 0).
    layer_cfg = []
    cur_h, cur_w = h, w
    for li, wgt in enumerate(weights):
        k = wgt.shape[2]
        stride, pad = (2, 1) if li < len(weights) - 1 else (1, 0)
        oh = (cur_h + 2 * pad - k) // stride + 1
        ow = (cur_w + 2 * pad - k) // stride + 1
        layer_cfg.append((wgt, stride, pad, cur_h, cur_w, oh, ow))
        cur_h, cur_w = oh, ow

    # x.float() (Conv2dBlock.forward), then NCHW -> (N*H, W*C) slab in bf16.
    a0 = jnp.transpose(x_nchw.astype(jnp.float32), (0, 2, 3, 1))
    a0 = a0.reshape(n * h, w * cin0).astype(compute_dtype)

    operands = [a0]
    acts = []
    flops = 0
    for li, (wgt, stride, pad, ih, iw, oh, ow) in enumerate(layer_cfg):
        cout, cin, k, _ = wgt.shape
        r = jnp.asarray(_row_select(n, ih, oh, k, stride, pad),
                        dtype=compute_dtype)             # exact 0/1 values
        nm = _col_fold(wgt, iw, ow, stride, pad).astype(compute_dtype)
        operands += [r, nm]
        # TODO(synk): norm='instance_norm'/'batch_norm' branches of Conv2dBlock
        # and the d_fully_connected (Flatten+Linear) path are not exercised by
        # this configuration and are not implemented here.
        acts.append("leaky" if li < len(layer_cfg) - 1 else "sigmoid")
        flops += 2 * k * (n * ih * (iw * cin) * (ow * cout)      # A @ Nmat[kh]
                          + (n * oh) * (n * ih) * (ow * cout))   # R[kh] @ (...)

    w_last, _, _, _, _, oh_l, ow_l = layer_cfg[-1]
    cout_l = w_last.shape[0]
    out_rows, out_cols = n * oh_l, ow_l * cout_l

    bytes_accessed = sum(int(np.prod(o.shape)) * o.dtype.itemsize for o in operands)
    bytes_accessed += out_rows * out_cols * 4

    # NOTE: at input_size=16 everything (~75 KiB) fits VMEM on every TPU
    # generation.  For large input_size/batch the row dimension of `a0` would
    # need to be tiled with a 'parallel' grid axis (esp. v7x: 64 MiB VMEM,
    # 2 TensorCores); not needed at this problem size.
    out2d = pl.pallas_call(
        _make_disc_kernel(len(layer_cfg), tuple(acts), compute_dtype),
        out_shape=jax.ShapeDtypeStruct((out_rows, out_cols), jnp.float32),
        in_specs=[pl.BlockSpec(memory_space=pltpu.MemorySpace.VMEM)] * len(operands),
        out_specs=pl.BlockSpec(memory_space=pltpu.MemorySpace.VMEM),
        cost_estimate=pl.CostEstimate(flops=int(flops),
                                      transcendentals=int(out_rows * out_cols),
                                      bytes_accessed=int(bytes_accessed)),
    )(*operands)

    # rows=(n, oh), cols=(ow, co)  ->  NCHW
    return out2d.reshape(n, oh_l, ow_l, cout_l).transpose(0, 3, 1, 2)


# ------------------------- weight construction ----------------------------- #
def build_discriminator_weights(key, input_size, input_dim, dim):
    """Mirror Discriminator.__init__ (norm='none', d_fully_connected=False)."""
    n_downsample = 0
    s = input_size
    while s > 8:
        s = int(s / 2)
        n_downsample += 1
    shapes = [(dim, input_dim, 4, 4)]
    d = dim
    for _ in range(n_downsample):
        nd = min(d * 2, 512)
        shapes.append((nd, d, 4, 4))
        d = nd
    shapes.append((1, d, 4, 4))                 # final conv to 1 channel
    keys = jax.random.split(key, len(shapes))
    return [0.1 * jax.random.normal(k, shp, dtype=jnp.float32)
            for k, shp in zip(keys, shapes)]


# --------------------------- pure-JAX reference ---------------------------- #
def _reference_forward(x, weights):
    def conv(y, w, stride, pad):
        return jax.lax.conv_general_dilated(
            y, w, (stride, stride), [(pad, pad), (pad, pad)],
            dimension_numbers=("NCHW", "OIHW", "NCHW"))
    y = x.astype(jnp.float32)
    y = conv(y, weights[0], 2, 1)
    y = jnp.where(y >= 0, y, 0.2 * y)
    for w in weights[1:-1]:
        y = conv(y, w, 2, 1)
        y = jnp.where(y >= 0, y, 0.2 * y)
    y = conv(y, weights[-1], 1, 0)
    return jax.nn.sigmoid(y)


if __name__ == "__main__":
    key = jax.random.PRNGKey(0)
    k_x, k_w = jax.random.split(key)

    # Discriminator(input_size=16, input_dim=4, dim=8, norm='none',
    #               last_activation='sigmoid', d_fully_connected=False,
    #               d_nlayers=0)
    input_size, input_dim, dim = 16, 4, 8
    batch = 2

    x = jax.random.normal(k_x, (batch, input_dim, input_size, input_size),
                          dtype=jnp.float32)
    weights = build_discriminator_weights(k_w, input_size, input_dim, dim)

    fwd = jax.jit(discriminator_forward)
    out = jax.block_until_ready(fwd(x, weights))
    ref = jax.block_until_ready(_reference_forward(x, weights))

    assert out.shape == (batch, 1, 1, 1), out.shape
    # bf16 MXU inputs with f32 accumulation -> loosened tolerance vs f32 ref.
    assert jnp.allclose(out, ref, atol=2e-2, rtol=2e-2), (out, ref)

    print("KERNEL_OK")
</pallas_src>

<mosaic_0001>
module attributes {stable_mosaic.version = 11 : i64} {
  func.func @kernel(%arg0: memref<32x64xbf16, #tpu.memory_space<vmem>>, %arg1: memref<4x16x32xbf16, #tpu.memory_space<vmem>>, %arg2: memref<4x64x64xbf16, #tpu.memory_space<vmem>>, %arg3: memref<4x8x16xbf16, #tpu.memory_space<vmem>>, %arg4: memref<4x64x64xbf16, #tpu.memory_space<vmem>>, %arg5: memref<4x2x8xbf16, #tpu.memory_space<vmem>>, %arg6: memref<4x64x1xbf16, #tpu.memory_space<vmem>>, %arg7: memref<2x1xf32, #tpu.memory_space<vmem>>) attributes {dimension_semantics = [], scalar_prefetch = 0 : i64, scratch_operands = 0 : i64, tpu.core_type = #tpu.core_type<tc>} {
    %c0 = arith.constant 0 : index
    %c0_0 = arith.constant 0 : index
    %0 = vector.load %arg0[%c0, %c0_0] : memref<32x64xbf16, #tpu.memory_space<vmem>>, vector<32x64xbf16>
    %cst = arith.constant 0.000000e+00 : f32
    %1 = vector.broadcast %cst : f32 to vector<16x64xf32>
    %c0_1 = arith.constant 0 : index
    %c0_2 = arith.constant 0 : index
    %c0_3 = arith.constant 0 : index
    %2 = vector.load %arg2[%c0_1, %c0_2, %c0_3] : memref<4x64x64xbf16, #tpu.memory_space<vmem>>, vector<1x64x64xbf16>
    %3 = vector.shape_cast %2 : vector<1x64x64xbf16> to vector<64x64xbf16>
    %cst_4 = arith.constant dense<0.000000e+00> : vector<32x64xf32>
    %4 = tpu.matmul %0, %3, %cst_4 {dimension_numbers = #tpu.dot_dimension_numbers<[1], [0], [0], [1], [0, 0, 1, 1], [], []>} : vector<32x64xbf16>, vector<64x64xbf16>, vector<32x64xf32> -> vector<32x64xf32>
    %c0_5 = arith.constant 0 : index
    %c0_6 = arith.constant 0 : index
    %c0_7 = arith.constant 0 : index
    %5 = vector.load %arg1[%c0_5, %c0_6, %c0_7] : memref<4x16x32xbf16, #tpu.memory_space<vmem>>, vector<1x16x32xbf16>
    %6 = vector.shape_cast %5 : vector<1x16x32xbf16> to vector<16x32xbf16>
    %7 = arith.truncf %4 : vector<32x64xf32> to vector<32x64xbf16>
    %cst_8 = arith.constant dense<0.000000e+00> : vector<16x64xf32>
    %8 = tpu.matmul %6, %7, %cst_8 {dimension_numbers = #tpu.dot_dimension_numbers<[1], [0], [0], [1], [0, 0, 1, 1], [], []>} : vector<16x32xbf16>, vector<32x64xbf16>, vector<16x64xf32> -> vector<16x64xf32>
    %9 = arith.addf %1, %8 : vector<16x64xf32>
    %c1 = arith.constant 1 : index
    %c0_9 = arith.constant 0 : index
    %c0_10 = arith.constant 0 : index
    %10 = vector.load %arg2[%c1, %c0_9, %c0_10] : memref<4x64x64xbf16, #tpu.memory_space<vmem>>, vector<1x64x64xbf16>
    %11 = vector.shape_cast %10 : vector<1x64x64xbf16> to vector<64x64xbf16>
    %cst_11 = arith.constant dense<0.000000e+00> : vector<32x64xf32>
    %12 = tpu.matmul %0, %11, %cst_11 {dimension_numbers = #tpu.dot_dimension_numbers<[1], [0], [0], [1], [0, 0, 1, 1], [], []>} : vector<32x64xbf16>, vector<64x64xbf16>, vector<32x64xf32> -> vector<32x64xf32>
    %c1_12 = arith.constant 1 : index
    %c0_13 = arith.constant 0 : index
    %c0_14 = arith.constant 0 : index
    %13 = vector.load %arg1[%c1_12, %c0_13, %c0_14] : memref<4x16x32xbf16, #tpu.memory_space<vmem>>, vector<1x16x32xbf16>
    %14 = vector.shape_cast %13 : vector<1x16x32xbf16> to vector<16x32xbf16>
    %15 = arith.truncf %12 : vector<32x64xf32> to vector<32x64xbf16>
    %cst_15 = arith.constant dense<0.000000e+00> : vector<16x64xf32>
    %16 = tpu.matmul %14, %15, %cst_15 {dimension_numbers = #tpu.dot_dimension_numbers<[1], [0], [0], [1], [0, 0, 1, 1], [], []>} : vector<16x32xbf16>, vector<32x64xbf16>, vector<16x64xf32> -> vector<16x64xf32>
    %17 = arith.addf %9, %16 : vector<16x64xf32>
    %c2 = arith.constant 2 : index
    %c0_16 = arith.constant 0 : index
    %c0_17 = arith.constant 0 : index
    %18 = vector.load %arg2[%c2, %c0_16, %c0_17] : memref<4x64x64xbf16, #tpu.memory_space<vmem>>, vector<1x64x64xbf16>
    %19 = vector.shape_cast %18 : vector<1x64x64xbf16> to vector<64x64xbf16>
    %cst_18 = arith.constant dense<0.000000e+00> : vector<32x64xf32>
    %20 = tpu.matmul %0, %19, %cst_18 {dimension_numbers = #tpu.dot_dimension_numbers<[1], [0], [0], [1], [0, 0, 1, 1], [], []>} : vector<32x64xbf16>, vector<64x64xbf16>, vector<32x64xf32> -> vector<32x64xf32>
    %c2_19 = arith.constant 2 : index
    %c0_20 = arith.constant 0 : index
    %c0_21 = arith.constant 0 : index
    %21 = vector.load %arg1[%c2_19, %c0_20, %c0_21] : memref<4x16x32xbf16, #tpu.memory_space<vmem>>, vector<1x16x32xbf16>
    %22 = vector.shape_cast %21 : vector<1x16x32xbf16> to vector<16x32xbf16>
    %23 = arith.truncf %20 : vector<32x64xf32> to vector<32x64xbf16>
    %cst_22 = arith.constant dense<0.000000e+00> : vector<16x64xf32>
    %24 = tpu.matmul %22, %23, %cst_22 {dimension_numbers = #tpu.dot_dimension_numbers<[1], [0], [0], [1], [0, 0, 1, 1], [], []>} : vector<16x32xbf16>, vector<32x64xbf16>, vector<16x64xf32> -> vector<16x64xf32>
    %25 = arith.addf %17, %24 : vector<16x64xf32>
    %c3 = arith.constant 3 : index
    %c0_23 = arith.constant 0 : index
    %c0_24 = arith.constant 0 : index
    %26 = vector.load %arg2[%c3, %c0_23, %c0_24] : memref<4x64x64xbf16, #tpu.memory_space<vmem>>, vector<1x64x64xbf16>
    %27 = vector.shape_cast %26 : vector<1x64x64xbf16> to vector<64x64xbf16>
    %cst_25 = arith.constant dense<0.000000e+00> : vector<32x64xf32>
    %28 = tpu.matmul %0, %27, %cst_25 {dimension_numbers = #tpu.dot_dimension_numbers<[1], [0], [0], [1], [0, 0, 1, 1], [], []>} : vector<32x64xbf16>, vector<64x64xbf16>, vector<32x64xf32> -> vector<32x64xf32>
    %c3_26 = arith.constant 3 : index
    %c0_27 = arith.constant 0 : index
    %c0_28 = arith.constant 0 : index
    %29 = vector.load %arg1[%c3_26, %c0_27, %c0_28] : memref<4x16x32xbf16, #tpu.memory_space<vmem>>, vector<1x16x32xbf16>
    %30 = vector.shape_cast %29 : vector<1x16x32xbf16> to vector<16x32xbf16>
    %31 = arith.truncf %28 : vector<32x64xf32> to vector<32x64xbf16>
    %cst_29 = arith.constant dense<0.000000e+00> : vector<16x64xf32>
    %32 = tpu.matmul %30, %31, %cst_29 {dimension_numbers = #tpu.dot_dimension_numbers<[1], [0], [0], [1], [0, 0, 1, 1], [], []>} : vector<16x32xbf16>, vector<32x64xbf16>, vector<16x64xf32> -> vector<16x64xf32>
    %33 = arith.addf %25, %32 : vector<16x64xf32>
    %cst_30 = arith.constant 0.000000e+00 : f32
    %34 = vector.broadcast %cst_30 : f32 to vector<16x64xf32>
    %35 = arith.cmpf oge, %33, %34 : vector<16x64xf32>
    %cst_31 = arith.constant 2.000000e-01 : f32
    %36 = vector.broadcast %cst_31 : f32 to vector<16x64xf32>
    %37 = arith.mulf %36, %33 : vector<16x64xf32>
    %38 = arith.select %35, %33, %37 : vector<16x64xi1>, vector<16x64xf32>
    %39 = arith.truncf %38 : vector<16x64xf32> to vector<16x64xbf16>
    %cst_32 = arith.constant 0.000000e+00 : f32
    %40 = vector.broadcast %cst_32 : f32 to vector<8x64xf32>
    %c0_33 = arith.constant 0 : index
    %c0_34 = arith.constant 0 : index
    %c0_35 = arith.constant 0 : index
    %41 = vector.load %arg4[%c0_33, %c0_34, %c0_35] : memref<4x64x64xbf16, #tpu.memory_space<vmem>>, vector<1x64x64xbf16>
    %42 = vector.shape_cast %41 : vector<1x64x64xbf16> to vector<64x64xbf16>
    %cst_36 = arith.constant dense<0.000000e+00> : vector<16x64xf32>
    %43 = tpu.matmul %39, %42, %cst_36 {dimension_numbers = #tpu.dot_dimension_numbers<[1], [0], [0], [1], [0, 0, 1, 1], [], []>} : vector<16x64xbf16>, vector<64x64xbf16>, vector<16x64xf32> -> vector<16x64xf32>
    %c0_37 = arith.constant 0 : index
    %c0_38 = arith.constant 0 : index
    %c0_39 = arith.constant 0 : index
    %44 = vector.load %arg3[%c0_37, %c0_38, %c0_39] : memref<4x8x16xbf16, #tpu.memory_space<vmem>>, vector<1x8x16xbf16>
    %45 = vector.shape_cast %44 : vector<1x8x16xbf16> to vector<8x16xbf16>
    %46 = arith.truncf %43 : vector<16x64xf32> to vector<16x64xbf16>
    %cst_40 = arith.constant dense<0.000000e+00> : vector<8x64xf32>
    %47 = tpu.matmul %45, %46, %cst_40 {dimension_numbers = #tpu.dot_dimension_numbers<[1], [0], [0], [1], [0, 0, 1, 1], [], []>} : vector<8x16xbf16>, vector<16x64xbf16>, vector<8x64xf32> -> vector<8x64xf32>
    %48 = arith.addf %40, %47 : vector<8x64xf32>
    %c1_41 = arith.constant 1 : index
    %c0_42 = arith.constant 0 : index
    %c0_43 = arith.constant 0 : index
    %49 = vector.load %arg4[%c1_41, %c0_42, %c0_43] : memref<4x64x64xbf16, #tpu.memory_space<vmem>>, vector<1x64x64xbf16>
    %50 = vector.shape_cast %49 : vector<1x64x64xbf16> to vector<64x64xbf16>
    %cst_44 = arith.constant dense<0.000000e+00> : vector<16x64xf32>
    %51 = tpu.matmul %39, %50, %cst_44 {dimension_numbers = #tpu.dot_dimension_numbers<[1], [0], [0], [1], [0, 0, 1, 1], [], []>} : vector<16x64xbf16>, vector<64x64xbf16>, vector<16x64xf32> -> vector<16x64xf32>
    %c1_45 = arith.constant 1 : index
    %c0_46 = arith.constant 0 : index
    %c0_47 = arith.constant 0 : index
    %52 = vector.load %arg3[%c1_45, %c0_46, %c0_47] : memref<4x8x16xbf16, #tpu.memory_space<vmem>>, vector<1x8x16xbf16>
    %53 = vector.shape_cast %52 : vector<1x8x16xbf16> to vector<8x16xbf16>
    %54 = arith.truncf %51 : vector<16x64xf32> to vector<16x64xbf16>
    %cst_48 = arith.constant dense<0.000000e+00> : vector<8x64xf32>
    %55 = tpu.matmul %53, %54, %cst_48 {dimension_numbers = #tpu.dot_dimension_numbers<[1], [0], [0], [1], [0, 0, 1, 1], [], []>} : vector<8x16xbf16>, vector<16x64xbf16>, vector<8x64xf32> -> vector<8x64xf32>
    %56 = arith.addf %48, %55 : vector<8x64xf32>
    %c2_49 = arith.constant 2 : index
    %c0_50 = arith.constant 0 : index
    %c0_51 = arith.constant 0 : index
    %57 = vector.load %arg4[%c2_49, %c0_50, %c0_51] : memref<4x64x64xbf16, #tpu.memory_space<vmem>>, vector<1x64x64xbf16>
    %58 = vector.shape_cast %57 : vector<1x64x64xbf16> to vector<64x64xbf16>
    %cst_52 = arith.constant dense<0.000000e+00> : vector<16x64xf32>
    %59 = tpu.matmul %39, %58, %cst_52 {dimension_numbers = #tpu.dot_dimension_numbers<[1], [0], [0], [1], [0, 0, 1, 1], [], []>} : vector<16x64xbf16>, vector<64x64xbf16>, vector<16x64xf32> -> vector<16x64xf32>
    %c2_53 = arith.constant 2 : index
    %c0_54 = arith.constant 0 : index
    %c0_55 = arith.constant 0 : index
    %60 = vector.load %arg3[%c2_53, %c0_54, %c0_55] : memref<4x8x16xbf16, #tpu.memory_space<vmem>>, vector<1x8x16xbf16>
    %61 = vector.shape_cast %60 : vector<1x8x16xbf16> to vector<8x16xbf16>
    %62 = arith.truncf %59 : vector<16x64xf32> to vector<16x64xbf16>
    %cst_56 = arith.constant dense<0.000000e+00> : vector<8x64xf32>
    %63 = tpu.matmul %61, %62, %cst_56 {dimension_numbers = #tpu.dot_dimension_numbers<[1], [0], [0], [1], [0, 0, 1, 1], [], []>} : vector<8x16xbf16>, vector<16x64xbf16>, vector<8x64xf32> -> vector<8x64xf32>
    %64 = arith.addf %56, %63 : vector<8x64xf32>
    %c3_57 = arith.constant 3 : index
    %c0_58 = arith.constant 0 : index
    %c0_59 = arith.constant 0 : index
    %65 = vector.load %arg4[%c3_57, %c0_58, %c0_59] : memref<4x64x64xbf16, #tpu.memory_space<vmem>>, vector<1x64x64xbf16>
    %66 = vector.shape_cast %65 : vector<1x64x64xbf16> to vector<64x64xbf16>
    %cst_60 = arith.constant dense<0.000000e+00> : vector<16x64xf32>
    %67 = tpu.matmul %39, %66, %cst_60 {dimension_numbers = #tpu.dot_dimension_numbers<[1], [0], [0], [1], [0, 0, 1, 1], [], []>} : vector<16x64xbf16>, vector<64x64xbf16>, vector<16x64xf32> -> vector<16x64xf32>
    %c3_61 = arith.constant 3 : index
    %c0_62 = arith.constant 0 : index
    %c0_63 = arith.constant 0 : index
    %68 = vector.load %arg3[%c3_61, %c0_62, %c0_63] : memref<4x8x16xbf16, #tpu.memory_space<vmem>>, vector<1x8x16xbf16>
    %69 = vector.shape_cast %68 : vector<1x8x16xbf16> to vector<8x16xbf16>
    %70 = arith.truncf %67 : vector<16x64xf32> to vector<16x64xbf16>
    %cst_64 = arith.constant dense<0.000000e+00> : vector<8x64xf32>
    %71 = tpu.matmul %69, %70, %cst_64 {dimension_numbers = #tpu.dot_dimension_numbers<[1], [0], [0], [1], [0, 0, 1, 1], [], []>} : vector<8x16xbf16>, vector<16x64xbf16>, vector<8x64xf32> -> vector<8x64xf32>
    %72 = arith.addf %64, %71 : vector<8x64xf32>
    %cst_65 = arith.constant 0.000000e+00 : f32
    %73 = vector.broadcast %cst_65 : f32 to vector<8x64xf32>
    %74 = arith.cmpf oge, %72, %73 : vector<8x64xf32>
    %cst_66 = arith.constant 2.000000e-01 : f32
    %75 = vector.broadcast %cst_66 : f32 to vector<8x64xf32>
    %76 = arith.mulf %75, %72 : vector<8x64xf32>
    %77 = arith.select %74, %72, %76 : vector<8x64xi1>, vector<8x64xf32>
    %78 = arith.truncf %77 : vector<8x64xf32> to vector<8x64xbf16>
    %cst_67 = arith.constant 0.000000e+00 : f32
    %79 = vector.broadcast %cst_67 : f32 to vector<2x1xf32>
    %c0_68 = arith.constant 0 : index
    %c0_69 = arith.constant 0 : index
    %c0_70 = arith.constant 0 : index
    %80 = vector.load %arg6[%c0_68, %c0_69, %c0_70] : memref<4x64x1xbf16, #tpu.memory_space<vmem>>, vector<1x64x1xbf16>
    %81 = vector.shape_cast %80 : vector<1x64x1xbf16> to vector<64x1xbf16>
    %cst_71 = arith.constant dense<0.000000e+00> : vector<8x1xf32>
    %82 = tpu.matmul %78, %81, %cst_71 {dimension_numbers = #tpu.dot_dimension_numbers<[1], [0], [0], [1], [0, 0, 1, 1], [], []>} : vector<8x64xbf16>, vector<64x1xbf16>, vector<8x1xf32> -> vector<8x1xf32>
    %c0_72 = arith.constant 0 : index
    %c0_73 = arith.constant 0 : index
    %c0_74 = arith.constant 0 : index
    %83 = vector.load %arg5[%c0_72, %c0_73, %c0_74] : memref<4x2x8xbf16, #tpu.memory_space<vmem>>, vector<1x2x8xbf16>
    %84 = vector.shape_cast %83 : vector<1x2x8xbf16> to vector<2x8xbf16>
    %85 = arith.truncf %82 : vector<8x1xf32> to vector<8x1xbf16>
    %cst_75 = arith.constant dense<0.000000e+00> : vector<2x1xf32>
    %86 = tpu.matmul %84, %85, %cst_75 {dimension_numbers = #tpu.dot_dimension_numbers<[1], [0], [0], [1], [0, 0, 1, 1], [], []>} : vector<2x8xbf16>, vector<8x1xbf16>, vector<2x1xf32> -> vector<2x1xf32>
    %87 = arith.addf %79, %86 : vector<2x1xf32>
    %c1_76 = arith.constant 1 : index
    %c0_77 = arith.constant 0 : index
    %c0_78 = arith.constant 0 : index
    %88 = vector.load %arg6[%c1_76, %c0_77, %c0_78] : memref<4x64x1xbf16, #tpu.memory_space<vmem>>, vector<1x64x1xbf16>
    %89 = vector.shape_cast %88 : vector<1x64x1xbf16> to vector<64x1xbf16>
    %cst_79 = arith.constant dense<0.000000e+00> : vector<8x1xf32>
    %90 = tpu.matmul %78, %89, %cst_79 {dimension_numbers = #tpu.dot_dimension_numbers<[1], [0], [0], [1], [0, 0, 1, 1], [], []>} : vector<8x64xbf16>, vector<64x1xbf16>, vector<8x1xf32> -> vector<8x1xf32>
    %c1_80 = arith.constant 1 : index
    %c0_81 = arith.constant 0 : index
    %c0_82 = arith.constant 0 : index
    %91 = vector.load %arg5[%c1_80, %c0_81, %c0_82] : memref<4x2x8xbf16, #tpu.memory_space<vmem>>, vector<1x2x8xbf16>
    %92 = vector.shape_cast %91 : vector<1x2x8xbf16> to vector<2x8xbf16>
    %93 = arith.truncf %90 : vector<8x1xf32> to vector<8x1xbf16>
    %cst_83 = arith.constant dense<0.000000e+00> : vector<2x1xf32>
    %94 = tpu.matmul %92, %93, %cst_83 {dimension_numbers = #tpu.dot_dimension_numbers<[1], [0], [0], [1], [0, 0, 1, 1], [], []>} : vector<2x8xbf16>, vector<8x1xbf16>, vector<2x1xf32> -> vector<2x1xf32>
    %95 = arith.addf %87, %94 : vector<2x1xf32>
    %c2_84 = arith.constant 2 : index
    %c0_85 = arith.constant 0 : index
    %c0_86 = arith.constant 0 : index
    %96 = vector.load %arg6[%c2_84, %c0_85, %c0_86] : memref<4x64x1xbf16, #tpu.memory_space<vmem>>, vector<1x64x1xbf16>
    %97 = vector.shape_cast %96 : vector<1x64x1xbf16> to vector<64x1xbf16>
    %cst_87 = arith.constant dense<0.000000e+00> : vector<8x1xf32>
    %98 = tpu.matmul %78, %97, %cst_87 {dimension_numbers = #tpu.dot_dimension_numbers<[1], [0], [0], [1], [0, 0, 1, 1], [], []>} : vector<8x64xbf16>, vector<64x1xbf16>, vector<8x1xf32> -> vector<8x1xf32>
    %c2_88 = arith.constant 2 : index
    %c0_89 = arith.constant 0 : index
    %c0_90 = arith.constant 0 : index
    %99 = vector.load %arg5[%c2_88, %c0_89, %c0_90] : memref<4x2x8xbf16, #tpu.memory_space<vmem>>, vector<1x2x8xbf16>
    %100 = vector.shape_cast %99 : vector<1x2x8xbf16> to vector<2x8xbf16>
    %101 = arith.truncf %98 : vector<8x1xf32> to vector<8x1xbf16>
    %cst_91 = arith.constant dense<0.000000e+00> : vector<2x1xf32>
    %102 = tpu.matmul %100, %101, %cst_91 {dimension_numbers = #tpu.dot_dimension_numbers<[1], [0], [0], [1], [0, 0, 1, 1], [], []>} : vector<2x8xbf16>, vector<8x1xbf16>, vector<2x1xf32> -> vector<2x1xf32>
    %103 = arith.addf %95, %102 : vector<2x1xf32>
    %c3_92 = arith.constant 3 : index
    %c0_93 = arith.constant 0 : index
    %c0_94 = arith.constant 0 : index
    %104 = vector.load %arg6[%c3_92, %c0_93, %c0_94] : memref<4x64x1xbf16, #tpu.memory_space<vmem>>, vector<1x64x1xbf16>
    %105 = vector.shape_cast %104 : vector<1x64x1xbf16> to vector<64x1xbf16>
    %cst_95 = arith.constant dense<0.000000e+00> : vector<8x1xf32>
    %106 = tpu.matmul %78, %105, %cst_95 {dimension_numbers = #tpu.dot_dimension_numbers<[1], [0], [0], [1], [0, 0, 1, 1], [], []>} : vector<8x64xbf16>, vector<64x1xbf16>, vector<8x1xf32> -> vector<8x1xf32>
    %c3_96 = arith.constant 3 : index
    %c0_97 = arith.constant 0 : index
    %c0_98 = arith.constant 0 : index
    %107 = vector.load %arg5[%c3_96, %c0_97, %c0_98] : memref<4x2x8xbf16, #tpu.memory_space<vmem>>, vector<1x2x8xbf16>
    %108 = vector.shape_cast %107 : vector<1x2x8xbf16> to vector<2x8xbf16>
    %109 = arith.truncf %106 : vector<8x1xf32> to vector<8x1xbf16>
    %cst_99 = arith.constant dense<0.000000e+00> : vector<2x1xf32>
    %110 = tpu.matmul %108, %109, %cst_99 {dimension_numbers = #tpu.dot_dimension_numbers<[1], [0], [0], [1], [0, 0, 1, 1], [], []>} : vector<2x8xbf16>, vector<8x1xbf16>, vector<2x1xf32> -> vector<2x1xf32>
    %111 = arith.addf %103, %110 : vector<2x1xf32>
    %112 = arith.negf %111 : vector<2x1xf32>
    %113 = math.exp %112 : vector<2x1xf32>
    %cst_100 = arith.constant 1.000000e+00 : f32
    %114 = vector.broadcast %cst_100 : f32 to vector<2x1xf32>
    %115 = arith.addf %114, %113 : vector<2x1xf32>
    %116 = arith.divf %114, %115 : vector<2x1xf32>
    %c0_101 = arith.constant 0 : index
    %c0_102 = arith.constant 0 : index
    %117 = vector.load %arg7[%c0_101, %c0_102] : memref<2x1xf32, #tpu.memory_space<vmem>>, vector<2x1xf32>
    tpu.vector_store %arg7[%c0_101, %c0_102], %116 {strides = array<i32>} : memref<2x1xf32, #tpu.memory_space<vmem>>, vector<2x1xf32>,
    return
  }
}

</mosaic_0001>

<bundles_post_ra>
// kernel: discriminator_forward.1
= control target key start
LH: loop header
LB: loop body
LE: loop exit
PB: predicated region body
PF: predicated region fallthrough
CT: control target
= control target key end

     0   :  { %vm73_vm0 = vcmask 523264   ;;  %v2174_v18 = vmov 0.0   ;;  %vm2175_vm1 = vmmov 0   ;;  %vm225_vm2 = vcmask 261120   ;;  %s2525_s2 = inlined_call_operand.vmem [shape: bf16[4,64,64], index: 2, kind: input, shape index: {}]   ;;  %s2526_s0 = inlined_call_operand.vmem [shape: bf16[32,64], index: 0, kind: input, shape index: {}]   ;;  %s2527_s1 = inlined_call_operand.vmem [shape: bf16[4,16,32], index: 1, kind: input, shape index: {}]   ;;  %s2528_s4 = inlined_call_operand.vmem [shape: bf16[4,64,64], index: 4, kind: input, shape index: {}]   ;;  %s2529_s6 = inlined_call_operand.vmem [shape: bf16[4,64,1], index: 6, kind: input, shape index: {}]   ;;  %s2530_s3 = inlined_call_operand.vmem [shape: bf16[4,8,16], index: 3, kind: input, shape index: {}]   ;;  %s2531_s5 = inlined_call_operand.vmem [shape: bf16[4,2,8], index: 5, kind: input, shape index: {}]   ;;  %s2532_s7 = inlined_call_operand.vmem [shape: f32[2,1], index: 7, kind: output, shape index: {}]  }
   0x1   :  { %v2116_v0 = vld [vmem:[%s2525_s2 + $0x20] sm:$0xff]   ;;  %v2117_v1 = vld [vmem:[%s2525_s2 + $0x28] sm:$0xff]   ;;  %v2119_v3 = vld [vmem:[%s2525_s2 + $0x30] sm:$0xff]   ;;  %vm757_vm5 = vcmask 130048   ;;  %vm1247_vm7 = vcmask 1043456   ;;  %vm1243_vm8 = vcmask 64512  }
   0x2   :  { %1866 = vmatprep.subr.bf16.mxu1 %v2116_v0  ;;  %v2118_v2 = vld [vmem:[%s2525_s2] sm:$0xff]   ;;  %v2120_v4 = vld [vmem:[%s2525_s2 + $0x8] sm:$0xff]   ;;  %v2123_v6 = vld [vmem:[%s2525_s2 + $0x10] sm:$0xff]   ;;  %vm1589_vm9 = vcmask 1024  }
   0x3   :  { %1867 = vmatpush3.bf16.msra.mxu1 %v2116_v0  ;;  %1854 = vmatprep.subr.bf16.mxu0 %v2118_v2  ;;  %v2122_v5 = vld [vmem:[%s2526_s0] sm:$0xff]   ;;  %v2121_v7 = vld [vmem:[%s2525_s2 + $0x38] sm:$0xff]   ;;  %v2124_v10 = vld [vmem:[%s2526_s0 + $0x8] sm:$0xff]  }
   0x4   :  { %1868 = vmatprep.subr.bf16.mxu1 %v2117_v1  ;;  %1855 = vmatpush3.bf16.msra.mxu0 %v2118_v2  ;;  %v2126_v8 = vld [vmem:[%s2525_s2 + $0x18] sm:$0xff]   ;;  %v2125_v9 = vld [vmem:[%s2525_s2 + $0x40] sm:$0xff]   ;;  %v2127_v11 = vld [vmem:[%s2525_s2 + $0x48] sm:$0xff]  }
   0x5   :  { %1856 = vmatprep.subr.bf16.mxu0 %v2120_v4  ;;  %1874 = vmatprep.mubr.msk.bf16.mxu1 %vm73_vm0, %v2122_v5  ;;  %v2128_v12 = vld [vmem:[%s2525_s2 + $0x50] sm:$0xff]   ;;  %v2129_v13 = vld [vmem:[%s2525_s2 + $0x58] sm:$0xff]   ;;  %v2130_v14 = vld [vmem:[%s2525_s2 + $0x60] sm:$0xff]  }
   0x6   :  { %1862 = vmatprep.mubr.msk.bf16.mxu0 %vm73_vm0, %v2122_v5  ;;  %v2131_v15 = vld [vmem:[%s2525_s2 + $0x68] sm:$0xff]   ;;  %v2132_v16 = vld [vmem:[%s2525_s2 + $0x70] sm:$0xff]   ;;  %v2133_v17 = vld [vmem:[%s2525_s2 + $0x78] sm:$0xff]  }
   0x7   :  { %1869 = vmatpush3.bf16.msra.mxu1 %v2117_v1  ;;  %v2138_v19 = vld [vmem:[%s2528_s4 + $0x20] sm:$0xff]   ;;  %v2140_v20 = vld [vmem:[%s2528_s4 + $0x28] sm:$0xff]   ;;  %v2136_v43 = vld [vmem:[%s2527_s1 + $0x10] sm:$0xff]  }
   0x8   :  { %1870 = vmatprep.subr.bf16.mxu1 %v2119_v3  ;;  %1857 = vmatpush3.bf16.msra.mxu0 %v2120_v4  ;;  %v2134_v33 = vld [vmem:[%s2527_s1 + $0x8] sm:$0xff]   ;;  %v2135_v40 = vld [vmem:[%s2527_s1] sm:$0xff]   ;;  %v2137_v48 = vld [vmem:[%s2527_s1 + $0x18] sm:$0xff]  }
   0x9   :  { %1858 = vmatprep.subr.bf16.mxu0 %v2123_v6  ;;  %v2139_v49 = vld [vmem:[%s2528_s4] sm:$0xff]   ;;  %v2141_v50 = vld [vmem:[%s2528_s4 + $0x8] sm:$0xff]   ;;  %v2142_v51 = vld [vmem:[%s2528_s4 + $0x30] sm:$0xff]  }
   0xa   :  { %v2143_v52 = vld [vmem:[%s2528_s4 + $0x10] sm:$0xff]   ;;  %v2144_v53 = vld [vmem:[%s2528_s4 + $0x38] sm:$0xff]   ;;  %v2146_v63 = vld [vmem:[%s2528_s4 + $0x40] sm:$0xff]  }
   0xb   :  { %1871 = vmatpush3.bf16.msra.mxu1 %v2119_v3  ;;  %v2145_v54 = vld [vmem:[%s2528_s4 + $0x18] sm:$0xff]   ;;  %v2147_v1 = vld [vmem:[%s2528_s4 + $0x48] sm:$0xff]   ;;  %v2148_v2 = vld [vmem:[%s2528_s4 + $0x50] sm:$0xff]  }
   0xc   :  { %1872 = vmatprep.subr.bf16.mxu1 %v2121_v7  ;;  %1859 = vmatpush3.bf16.msra.mxu0 %v2123_v6  ;;  %v2149_v3 = vld [vmem:[%s2528_s4 + $0x58] sm:$0xff]   ;;  %v2150_v4 = vld [vmem:[%s2528_s4 + $0x60] sm:$0xff]   ;;  %v2152_v6 = vld [vmem:[%s2528_s4 + $0x70] sm:$0xff]  }
   0xd   :  { %1860 = vmatprep.subr.bf16.mxu0 %v2126_v8 }
   0xf   :  { %1873 = vmatpush3.bf16.msra.mxu1 %v2121_v7  ;;  %v2153_v7 = vld [vmem:[%s2528_s4 + $0x78] sm:$0xff]  }
  0x10   :  { %1894 = vmatprep.subr.bf16.mxu1 %v2125_v9  ;;  %1861 = vmatpush3.bf16.msra.mxu0 %v2126_v8  ;;  %v2154_v8 = vld [vmem:[%s2529_s6 + $0x20] sm:$0xff]  }
  0x11   :  { %1878 = vmatprep.subr.bf16.mxu0 %v2174_v18 }
  0x12   :  { %1875 = vmatmul.mubr.msk.bf16.vlgmr.msra.gmra.mrb[0].mxu1 %vm73_vm0, %v2124_v10 }
  0x13   :  { %1895 = vmatpush3.bf16.msra.mxu1 %v2125_v9  ;;  %1902 = vmatprep.mubr.msk.bf16.mxu1 %vm73_vm0, %v2122_v5  ;;  %v2156_v9 = vld [vmem:[%s2529_s6 + $0x28] sm:$0xff]  }
  0x14   :  { %1896 = vmatprep.subr.bf16.mxu1 %v2127_v11  ;;  %1863 = vmatmul.mubr.msk.bf16.vlgmr.msra.gmra.mrb[0].mxu0 %vm73_vm0, %v2124_v10 }
  0x15   :  { %1882 = vmatprep.mubr.msk.bf16.mxu0 %vm2175_vm1, %v2174_v18 }
  0x17   :  { %1897 = vmatpush3.bf16.msra.mxu1 %v2127_v11 }
  0x18   :  { %1898 = vmatprep.subr.bf16.mxu1 %v2128_v12 }
  0x1b   :  { %1899 = vmatpush3.bf16.msra.mxu1 %v2128_v12 }
  0x1c   :  { %1900 = vmatprep.subr.bf16.mxu1 %v2129_v13 }
  0x1f   :  { %1901 = vmatpush3.bf16.msra.mxu1 %v2129_v13 }
  0x20   :  { %1914 = vmatprep.subr.bf16.mxu1 %v2130_v14 }
  0x22   :  { %1903 = vmatmul.mubr.msk.bf16.vlgmr.msra.gmra.mrb[4].mxu1 %vm73_vm0, %v2124_v10 }
  0x23   :  { %1915 = vmatpush3.bf16.msra.mxu1 %v2130_v14  ;;  %1922 = vmatprep.mubr.msk.bf16.mxu1 %vm73_vm0, %v2122_v5  ;;  %v2151_v5 = vld [vmem:[%s2528_s4 + $0x68] sm:$0xff]  }
  0x24   :  { %1916 = vmatprep.subr.bf16.mxu1 %v2131_v15 }
  0x27   :  { %1917 = vmatpush3.bf16.msra.mxu1 %v2131_v15 }
  0x28   :  { %1918 = vmatprep.subr.bf16.mxu1 %v2132_v16 }
  0x2b   :  { %1919 = vmatpush3.bf16.msra.mxu1 %v2132_v16 }
  0x2c   :  { %1920 = vmatprep.subr.bf16.mxu1 %v2133_v17 }
  0x2f   :  { %1921 = vmatpush3.bf16.msra.mxu1 %v2133_v17 }
  0x30   :  { %1946 = vmatprep.subr.bf16.mxu1 %v2174_v18 }
  0x32   :  { %1923 = vmatmul.mubr.msk.bf16.vlgmr.msra.gmra.mrb[8].mxu1 %vm73_vm0, %v2124_v10  ;;  %v2158_v10 = vld [vmem:[%s2529_s6 + $0x30] sm:$0xff]  }
  0x33   :  { %1954 = vmatprep.mubr.msk.bf16.mxu1 %vm2175_vm1, %v2174_v18  ;;  %1947 = vmatpush3.bf16.msra.mxu1 %v2138_v19 }
  0x34   :  { %1948 = vmatprep.subr.bf16.mxu1 %v2174_v18 }
  0x37   :  { %1949 = vmatpush3.bf16.msra.mxu1 %v2140_v20 }
  0x38   :  { %1950 = vmatprep.subr.bf16.mxu1 %v2174_v18 }
  0x3b   :  { %1951 = vmatpush3.bf16.msra.mxu1 %v2142_v51  ;;  %v2165_v51 = vld [vmem:[%s2529_s6 + $0x58] sm:$0xff]  }
  0x3c   :  { %1952 = vmatprep.subr.bf16.mxu1 %v2174_v18 }
  0x3f   :  { %1953 = vmatpush3.bf16.msra.mxu1 %v2144_v53  ;;  %v2167_v53 = vld [vmem:[%s2529_s6 + $0x68] sm:$0xff]  }
  0x40   :  { %1970 = vmatprep.subr.bf16.mxu1 %v2174_v18 }
  0xe5   :  { %v1876_v21 = vpop.f32.mrb[0].mxu1 }
  0xe6   :  { %v200_v22 = vpop.f32.mrb[1].mxu1 }
  0xe7   :  { %v1877_v23 = vpop.f32.mrb[2].mxu1  ;;  %v1864_v24 = vpop.f32.mrb[0].mxu0 }
  0xe8   :  { %v219_v25 = vpack.c.bf16 %v1877_v23, %v1876_v21  ;;  %v203_v26 = vpop.f32.mrb[3].mxu1  ;;  %v114_v27 = vpop.f32.mrb[1].mxu0 }
  0xe9   :  { %v218_v28 = vpack.c.bf16 %v203_v26, %v200_v22  ;;  %v1865_v29 = vpop.f32.mrb[2].mxu0  ;;  %v1677_v22 = vld [vmem:[%s2530_s3 + $0x4] sm:$0xf] }
  0xea   :  { %v132_v30 = vpack.c.bf16 %v1865_v29, %v1864_v24  ;;  %v117_v31 = vpop.f32.mrb[3].mxu0  ;;  %v1693_v29 = vld [vmem:[%s2530_s3 + $0x8] sm:$0xf] }
  0xeb   :  { %1879 = vmatpush3.bf16.msra.mxu0 %v218_v28  ;;  %v131_v32 = vpack.c.bf16 %v117_v31, %v114_v27 }
  0xec   :  { %1880 = vmatprep.subr.bf16.mxu0 %v2174_v18 }
  0xef   :  { %1881 = vmatpush3.bf16.msra.mxu0 %v219_v25  ;;  %v678_v25 = vld [vmem:[%s2530_s3] sm:$0xf] }
  0xf0   :  { %1886 = vmatprep.subr.bf16.mxu0 %v2174_v18 }
  0xf2   :  { %1883 = vmatmul.mubr.msk.bf16.vlgmr.msra.gmra.mrb[4].mxu0 %vm225_vm2, %v2134_v33 }
  0xf3   :  { %1887 = vmatpush3.bf16.msra.mxu0 %v131_v32  ;;  %1890 = vmatprep.mubr.msk.bf16.mxu0 %vm2175_vm1, %v2174_v18 }
  0xf4   :  { %1888 = vmatprep.subr.bf16.mxu0 %v2174_v18 }
  0xf5   :  { %v1904_v34 = vpop.f32.mrb[4].mxu1 }
  0xf6   :  { %v386_v35 = vpop.f32.mrb[5].mxu1 }
  0xf7   :  { %1889 = vmatpush3.bf16.msra.mxu0 %v132_v30  ;;  %v1905_v36 = vpop.f32.mrb[6].mxu1 }
  0xf8   :  { %v405_v37 = vpack.c.bf16 %v1905_v36, %v1904_v34  ;;  %v389_v38 = vpop.f32.mrb[7].mxu1  ;;  %1906 = vmatprep.subr.bf16.mxu0 %v2174_v18  ;;  %v2155_v36 = vld [vmem:[%s2529_s6] sm:$0xff]  }
  0xf9   :  { %v404_v39 = vpack.c.bf16 %v389_v38, %v386_v35  ;;  %v1708_v35 = vld [vmem:[%s2530_s3 + $0xc] sm:$0xf]  ;;  %v2159_v38 = vld [vmem:[%s2529_s6 + $0x10] sm:$0xff]  }
  0xfe   :  { %1891 = vmatmul.mubr.msk.bf16.vlgmr.msra.gmra.mrb[4].mxu0 %vm225_vm2, %v2135_v40  ;;  %v2161_v40 = vld [vmem:[%s2529_s6 + $0x18] sm:$0xff]  }
  0xff   :  { %1907 = vmatpush3.bf16.msra.mxu0 %v404_v39  ;;  %1910 = vmatprep.mubr.msk.bf16.mxu0 %vm2175_vm1, %v2174_v18  ;;  %v2160_v39 = vld [vmem:[%s2529_s6 + $0x38] sm:$0xff]  }
 0x100   :  { %1908 = vmatprep.subr.bf16.mxu0 %v2174_v18 }
 0x103   :  { %1909 = vmatpush3.bf16.msra.mxu0 %v405_v37  ;;  %v2157_v37 = vld [vmem:[%s2529_s6 + $0x8] sm:$0xff]  }
 0x104   :  { %1926 = vmatprep.subr.bf16.mxu0 %v2174_v18 }
 0x105   :  { %v1924_v41 = vpop.f32.mrb[8].mxu1 }
 0x106   :  { %v524_v42 = vpop.f32.mrb[9].mxu1 }
 0x107   :  { %v1925_v44 = vpop.f32.mrb[10].mxu1 }
 0x108   :  { %v543_v45 = vpack.c.bf16 %v1925_v44, %v1924_v41  ;;  %v527_v46 = vpop.f32.mrb[11].mxu1 }
 0x109   :  { %v542_v47 = vpack.c.bf16 %v527_v46, %v524_v42 }
 0x10a   :  { %1911 = vmatmul.mubr.msk.bf16.vlgmr.msra.gmra.mrb[4].mxu0 %vm225_vm2, %v2136_v43 }
 0x10b   :  { %1927 = vmatpush3.bf16.msra.mxu0 %v542_v47  ;;  %1930 = vmatprep.mubr.msk.bf16.mxu0 %vm2175_vm1, %v2174_v18  ;;  %v2162_v47 = vld [vmem:[%s2529_s6 + $0x40] sm:$0xff]  }
 0x10c   :  { %1928 = vmatprep.subr.bf16.mxu0 %v2174_v18 }
 0x10f   :  { %1929 = vmatpush3.bf16.msra.mxu0 %v543_v45 }
 0x110   :  { %1934 = vmatprep.subr.bf16.mxu0 %v2174_v18 }
 0x116   :  { %1931 = vmatmul.mubr.msk.bf16.vlgmr.msra.gmra.mrb[4].mxu0 %vm225_vm2, %v2137_v48 }
 0x117   :  { %1935 = vmatpush3.bf16.msra.mxu0 %v2139_v49  ;;  %1942 = vmatprep.mubr.msk.bf16.mxu0 %vm2175_vm1, %v2174_v18  ;;  %v2163_v49 = vld [vmem:[%s2529_s6 + $0x48] sm:$0xff]  }
 0x118   :  { %1936 = vmatprep.subr.bf16.mxu0 %v2174_v18 }
 0x11b   :  { %1937 = vmatpush3.bf16.msra.mxu0 %v2141_v50  ;;  %v2164_v50 = vld [vmem:[%s2529_s6 + $0x50] sm:$0xff]  }
 0x11c   :  { %1938 = vmatprep.subr.bf16.mxu0 %v2174_v18 }
 0x11f   :  { %1939 = vmatpush3.bf16.msra.mxu0 %v2143_v52  ;;  %v2166_v52 = vld [vmem:[%s2529_s6 + $0x60] sm:$0xff]  }
 0x120   :  { %1940 = vmatprep.subr.bf16.mxu0 %v2174_v18 }
 0x123   :  { %1941 = vmatpush3.bf16.msra.mxu0 %v2145_v54  ;;  %v2168_v54 = vld [vmem:[%s2529_s6 + $0x70] sm:$0xff]  }
 0x124   :  { %1958 = vmatprep.subr.bf16.mxu0 %v2174_v18 }
 0x1e9   :  { %v586_v55 = vpop.f32.mrb[4].mxu0 }
 0x1ea   :  { %v597_v56 = vmul.f32 0.2, %v586_v55  ;;  %v1932_v57 = vpop.f32.mrb[5].mxu0  ;;  %vm595_vm3 = vcmp.ge.f32.partialorder %v586_v55, 0.0 }
 0x1eb   :  { %v589_v58 = vpop.f32.mrb[6].mxu0 }
 0x1ec   :  { %vm596_vm4 = vcmp.ge.f32.partialorder %v589_v58, 0.0  ;;  %v598_v59 = vmul.f32 0.2, %v589_v58  ;;  %v1933_v60 = vpop.f32.mrb[7].mxu0  ;;  %v599_v61 = vsel %vm595_vm3, %v586_v55, %v597_v56  ;;  %v2169_v55 = vld [vmem:[%s2529_s6 + $0x78] sm:$0xff]  }
 0x1ee   :  { %v600_v62 = vsel %vm596_vm4, %v589_v58, %v598_v59 }
 0x1ef   :  { %v601_v0 = vpack.c.bf16 %v600_v62, %v599_v61 }
 0x1f1   :  { %1943 = vmatmul.mubr.msk.bf16.vlgmr.msra.gmra.mrb[8].mxu0 %vm73_vm0, %v601_v0  ;;  %1955 = vmatmul.mubr.msk.bf16.vlgmr.msra.gmra.mrb[12].mxu1 %vm73_vm0, %v601_v0 }
 0x1f2   :  { %1971 = vmatpush3.bf16.msra.mxu1 %v2146_v63  ;;  %1978 = vmatprep.mubr.msk.bf16.mxu1 %vm2175_vm1, %v2174_v18 }
 0x1f3   :  { %1972 = vmatprep.subr.bf16.mxu1 %v2174_v18  ;;  %1960 = vmatprep.mubr.msk.bf16.mxu0 %vm2175_vm1, %v2174_v18 }
 0x1f6   :  { %1973 = vmatpush3.bf16.msra.mxu1 %v2147_v1 }
 0x1f7   :  { %1974 = vmatprep.subr.bf16.mxu1 %v2174_v18 }
 0x1fa   :  { %1975 = vmatpush3.bf16.msra.mxu1 %v2148_v2 }
 0x1fb   :  { %1976 = vmatprep.subr.bf16.mxu1 %v2174_v18 }
 0x1fe   :  { %1977 = vmatpush3.bf16.msra.mxu1 %v2149_v3  ;;  %v1728_v3 = vld [vmem:[%s2531_s5 + $0x1] sm:$0x1] }
 0x1ff   :  { %1988 = vmatprep.subr.bf16.mxu1 %v2174_v18 }
 0x201   :  { %1979 = vmatmul.mubr.msk.bf16.vlgmr.msra.gmra.mrb[16].mxu1 %vm73_vm0, %v601_v0 }
 0x202   :  { %1989 = vmatpush3.bf16.msra.mxu1 %v2150_v4  ;;  %1996 = vmatprep.mubr.msk.bf16.mxu1 %vm2175_vm1, %v2174_v18 }
 0x203   :  { %1990 = vmatprep.subr.bf16.mxu1 %v2174_v18 }
 0x206   :  { %1991 = vmatpush3.bf16.msra.mxu1 %v2151_v5 }
 0x207   :  { %1992 = vmatprep.subr.bf16.mxu1 %v2174_v18 }
 0x20a   :  { %1993 = vmatpush3.bf16.msra.mxu1 %v2152_v6  ;;  %v1165_v6 = vld [vmem:[%s2531_s5] sm:$0x1] }
 0x20b   :  { %1994 = vmatprep.subr.bf16.mxu1 %v2174_v18 }
 0x20e   :  { %1995 = vmatpush3.bf16.msra.mxu1 %v2153_v7 }
 0x20f   :  { %2018 = vmatprep.subr.bf16.mxu1 %v2174_v18 }
 0x211   :  { %1997 = vmatmul.mubr.msk.bf16.vlgmr.msra.gmra.mrb[20].mxu1 %vm73_vm0, %v601_v0 }
 0x212   :  { %2026 = vmatprep.mubr.msk.bf16.mxu1 %vm2175_vm1, %v2174_v18  ;;  %2019 = vmatpush3.bf16.msra.mxu1 %v2154_v8 }
 0x213   :  { %2020 = vmatprep.subr.bf16.mxu1 %v2174_v18 }
 0x216   :  { %2021 = vmatpush3.bf16.msra.mxu1 %v2156_v9 }
 0x217   :  { %2022 = vmatprep.subr.bf16.mxu1 %v2174_v18 }
 0x21a   :  { %2023 = vmatpush3.bf16.msra.mxu1 %v2158_v10 }
 0x21b   :  { %2024 = vmatprep.subr.bf16.mxu1 %v2174_v18 }
 0x21e   :  { %2025 = vmatpush3.bf16.msra.mxu1 %v2160_v39 }
 0x21f   :  { %2042 = vmatprep.subr.bf16.mxu1 %v2174_v18 }
 0x2c4   :  { %v671_v11 = vpop.f32.mrb[8].mxu0  ;;  %v747_v12 = vpop.f32.mrb[12].mxu1 }
 0x2c5   :  { %v1944_v13 = vpop.f32.mrb[9].mxu0  ;;  %v1956_v14 = vpop.f32.mrb[13].mxu1 }
 0x2c6   :  { %v674_v15 = vpop.f32.mrb[10].mxu0  ;;  %v750_v16 = vpop.f32.mrb[14].mxu1 }
 0x2c7   :  { %v679_v17 = vpack.c.bf16 %v674_v15, %v671_v11  ;;  %v756_v19 = vpack.c.bf16 %v750_v16, %v747_v12  ;;  %v1945_v20 = vpop.f32.mrb[11].mxu0  ;;  %v1957_v21 = vpop.f32.mrb[15].mxu1  ;;  %v1744_v12 = vld [vmem:[%s2531_s5 + $0x2] sm:$0x1] }
 0x2c8   :  { %v1759_v20 = vld [vmem:[%s2531_s5 + $0x3] sm:$0x1] }
 0x2c9   :  { %1959 = vmatpush3.bf16.msra.mxu0 %v756_v19 }
 0x2ca   :  { %1964 = vmatprep.subr.bf16.mxu0 %v2174_v18 }
 0x2cc   :  { %1961 = vmatmul.mubr.msk.bf16.vlgmr.msra.gmra.mrb[12].mxu0 %vm757_vm5, %v1677_v22 }
 0x2cd   :  { %1965 = vmatpush3.bf16.msra.mxu0 %v679_v17  ;;  %1966 = vmatprep.mubr.msk.bf16.mxu0 %vm2175_vm1, %v2174_v18 }
 0x2ce   :  { %1982 = vmatprep.subr.bf16.mxu0 %v2174_v18 }
 0x2d4   :  { %v911_v23 = vpop.f32.mrb[16].mxu1 }
 0x2d5   :  { %v1980_v24 = vpop.f32.mrb[17].mxu1 }
 0x2d6   :  { %v914_v26 = vpop.f32.mrb[18].mxu1 }
 0x2d7   :  { %v920_v27 = vpack.c.bf16 %v914_v26, %v911_v23  ;;  %v1981_v28 = vpop.f32.mrb[19].mxu1 }
 0x2d8   :  { %1967 = vmatmul.mubr.msk.bf16.vlgmr.msra.gmra.mrb[12].mxu0 %vm757_vm5, %v678_v25 }
 0x2d9   :  { %1983 = vmatpush3.bf16.msra.mxu0 %v920_v27  ;;  %1984 = vmatprep.mubr.msk.bf16.mxu0 %vm2175_vm1, %v2174_v18 }
 0x2da   :  { %2000 = vmatprep.subr.bf16.mxu0 %v2174_v18 }
 0x2e4   :  { %v1032_v30 = vpop.f32.mrb[20].mxu1  ;;  %1985 = vmatmul.mubr.msk.bf16.vlgmr.msra.gmra.mrb[12].mxu0 %vm757_vm5, %v1693_v29 }
 0x2e5   :  { %v1998_v31 = vpop.f32.mrb[21].mxu1  ;;  %2002 = vmatprep.mubr.msk.bf16.mxu0 %vm2175_vm1, %v2174_v18 }
 0x2e6   :  { %v1035_v32 = vpop.f32.mrb[22].mxu1 }
 0x2e7   :  { %v1041_v33 = vpack.c.bf16 %v1035_v32, %v1032_v30  ;;  %v1999_v34 = vpop.f32.mrb[23].mxu1 }
 0x2e9   :  { %2001 = vmatpush3.bf16.msra.mxu0 %v1041_v33 }
 0x2ea   :  { %2006 = vmatprep.subr.bf16.mxu0 %v2174_v18 }
 0x2f0   :  { %2003 = vmatmul.mubr.msk.bf16.vlgmr.msra.gmra.mrb[12].mxu0 %vm757_vm5, %v1708_v35 }
 0x2f1   :  { %2007 = vmatpush3.bf16.msra.mxu0 %v2155_v36  ;;  %2014 = vmatprep.mubr.msk.bf16.mxu0 %vm2175_vm1, %v2174_v18 }
 0x2f2   :  { %2008 = vmatprep.subr.bf16.mxu0 %v2174_v18 }
 0x2f5   :  { %2009 = vmatpush3.bf16.msra.mxu0 %v2157_v37 }
 0x2f6   :  { %2010 = vmatprep.subr.bf16.mxu0 %v2174_v18 }
 0x2f9   :  { %2011 = vmatpush3.bf16.msra.mxu0 %v2159_v38 }
 0x2fa   :  { %2012 = vmatprep.subr.bf16.mxu0 %v2174_v18 }
 0x2fd   :  { %2013 = vmatpush3.bf16.msra.mxu0 %v2161_v40 }
 0x2fe   :  { %2030 = vmatprep.subr.bf16.mxu0 %v2174_v18 }
 0x3c3   :  { %v1079_v41 = vpop.f32.mrb[12].mxu0 }
 0x3c4   :  { %vm1086_vm6 = vcmp.ge.f32.partialorder %v1079_v41, 0.0  ;;  %v1087_v42 = vmul.f32 0.2, %v1079_v41  ;;  %v2004_v43 = vpop.f32.mrb[13].mxu0 }
 0x3c5   :  { %v1082_v44 = vpop.f32.mrb[14].mxu0 }
 0x3c6   :  { %v1088_v45 = vsel %vm1086_vm6, %v1079_v41, %v1087_v42  ;;  %v2005_v46 = vpop.f32.mrb[15].mxu0 }
 0x3c7   :  { %v1089_v48 = vpack.c.bf16 %v1088_v45, %v1088_v45 }
 0x3c9   :  { %2015 = vmatmul.mubr.msk.bf16.vlgmr.msra.gmra.mrb[16].mxu0 %vm73_vm0, %v1089_v48  ;;  %2027 = vmatmul.mubr.msk.bf16.vlgmr.msra.gmra.mrb[24].mxu1 %vm73_vm0, %v1089_v48 }
 0x3ca   :  { %2043 = vmatpush3.bf16.msra.mxu1 %v2162_v47  ;;  %2050 = vmatprep.mubr.msk.bf16.mxu1 %vm2175_vm1, %v2174_v18 }
 0x3cb   :  { %2044 = vmatprep.subr.bf16.mxu1 %v2174_v18  ;;  %2032 = vmatprep.mubr.msk.bf16.mxu0 %vm2175_vm1, %v2174_v18 }
 0x3ce   :  { %2045 = vmatpush3.bf16.msra.mxu1 %v2163_v49 }
 0x3cf   :  { %2046 = vmatprep.subr.bf16.mxu1 %v2174_v18 }
 0x3d2   :  { %2047 = vmatpush3.bf16.msra.mxu1 %v2164_v50 }
 0x3d3   :  { %2048 = vmatprep.subr.bf16.mxu1 %v2174_v18 }
 0x3d6   :  { %2049 = vmatpush3.bf16.msra.mxu1 %v2165_v51 }
 0x3d7   :  { %2060 = vmatprep.subr.bf16.mxu1 %v2174_v18 }
 0x3d9   :  { %2051 = vmatmul.mubr.msk.bf16.vlgmr.msra.gmra.mrb[28].mxu1 %vm73_vm0, %v1089_v48 }
 0x3da   :  { %2061 = vmatpush3.bf16.msra.mxu1 %v2166_v52  ;;  %2068 = vmatprep.mubr.msk.bf16.mxu1 %vm2175_vm1, %v2174_v18 }
 0x3db   :  { %2062 = vmatprep.subr.bf16.mxu1 %v2174_v18 }
 0x3de   :  { %2063 = vmatpush3.bf16.msra.mxu1 %v2167_v53 }
 0x3df   :  { %2064 = vmatprep.subr.bf16.mxu1 %v2174_v18 }
 0x3e2   :  { %2065 = vmatpush3.bf16.msra.mxu1 %v2168_v54 }
 0x3e3   :  { %2066 = vmatprep.subr.bf16.mxu1 %v2174_v18 }
 0x3e6   :  { %2067 = vmatpush3.bf16.msra.mxu1 %v2169_v55 }
 0x3e9   :  { %2069 = vmatmul.mubr.msk.bf16.vlgmr.msra.gmra.mrb[32].mxu1 %vm73_vm0, %v1089_v48 }
 0x49c   :  { %v1159_v56 = vpop.f32.mrb[16].mxu0  ;;  %v1234_v57 = vpop.f32.mrb[24].mxu1 }
 0x49d   :  { %v1242_v58 = vpack.c.bf16 %v1234_v57, %v1234_v57  ;;  %v2016_v59 = vpop.f32.mrb[17].mxu0  ;;  %v2028_v60 = vpop.f32.mrb[25].mxu1  ;;  %v1166_v63 = vpack.c.bf16 %v1159_v56, %v1159_v56 }
 0x49e   :  { %v1162_v61 = vpop.f32.mrb[18].mxu0  ;;  %v1237_v62 = vpop.f32.mrb[26].mxu1 }
 0x49f   :  { %v1249_v0 = vsel %vm1247_vm7, %v1242_v58, 0  ;;  %v2017_v1 = vpop.f32.mrb[19].mxu0  ;;  %v2029_v2 = vpop.f32.mrb[27].mxu1  ;;  %v1295_v4 = vsel %vm1247_vm7, %v1166_v63, 0 }
 0x4a0   :  { %2031 = vmatpush3.bf16.msra.mxu0 %v1249_v0 }
 0x4a1   :  { %2036 = vmatprep.subr.bf16.mxu0 %v2174_v18 }
 0x4a3   :  { %2033 = vmatmul.mubr.msk.bf16.vlgmr.msra.gmra.mrb[20].mxu0 %vm1243_vm8, %v1728_v3 }
 0x4a4   :  { %2037 = vmatpush3.bf16.msra.mxu0 %v1295_v4  ;;  %2038 = vmatprep.mubr.msk.bf16.mxu0 %vm2175_vm1, %v2174_v18 }
 0x4a5   :  { %2054 = vmatprep.subr.bf16.mxu0 %v2174_v18 }
 0x4ac   :  { %v1404_v5 = vpop.f32.mrb[28].mxu1 }
 0x4ad   :  { %v1412_v7 = vpack.c.bf16 %v1404_v5, %v1404_v5  ;;  %v2052_v8 = vpop.f32.mrb[29].mxu1 }
 0x4ae   :  { %v1407_v9 = vpop.f32.mrb[30].mxu1 }
 0x4af   :  { %v1417_v10 = vsel %vm1247_vm7, %v1412_v7, 0  ;;  %v2053_v11 = vpop.f32.mrb[31].mxu1  ;;  %2039 = vmatmul.mubr.msk.bf16.vlgmr.msra.gmra.mrb[20].mxu0 %vm1243_vm8, %v1165_v6 }
 0x4b0   :  { %2055 = vmatpush3.bf16.msra.mxu0 %v1417_v10  ;;  %2056 = vmatprep.mubr.msk.bf16.mxu0 %vm2175_vm1, %v2174_v18 }
 0x4b1   :  { %2072 = vmatprep.subr.bf16.mxu0 %v2174_v18 }
 0x4bb   :  { %2057 = vmatmul.mubr.msk.bf16.vlgmr.msra.gmra.mrb[20].mxu0 %vm1243_vm8, %v1744_v12 }
 0x4bc   :  { %v1527_v13 = vpop.f32.mrb[32].mxu1  ;;  %2074 = vmatprep.mubr.msk.bf16.mxu0 %vm2175_vm1, %v2174_v18 }
 0x4bd   :  { %v1535_v14 = vpack.c.bf16 %v1527_v13, %v1527_v13  ;;  %v2070_v15 = vpop.f32.mrb[33].mxu1 }
 0x4be   :  { %v1530_v16 = vpop.f32.mrb[34].mxu1 }
 0x4bf   :  { %v1540_v17 = vsel %vm1247_vm7, %v1535_v14, 0  ;;  %v2071_v19 = vpop.f32.mrb[35].mxu1 }
 0x4c0   :  { %2073 = vmatpush3.bf16.msra.mxu0 %v1540_v17 }
 0x4c7   :  { %2075 = vmatmul.mubr.msk.bf16.vlgmr.msra.gmra.mrb[20].mxu0 %vm1243_vm8, %v1759_v20 }
 0x59a   :  { %v1576_v21 = vpop.f32.mrb[20].mxu0 }
 0x59b   :  { %v1761_v22 = vmul.f32 -1.442695, %v1576_v21  ;;  %v2076_v23 = vpop.f32.mrb[21].mxu0 }
 0x59c   :  { %v1579_v24 = vpop.f32.mrb[22].mxu0 }
 0x59d   :  { %2170 = vpow2.f32 %v1761_v22  ;;  %v2077_v25 = vpop.f32.mrb[23].mxu0 }
 0x5a7   :  { %v2171_v18 = vpop.eup %2170 }
 0x5a8   :  { %v1586_v26 = vadd.f32 1.0, %v2171_v18 }
 0x5aa   :  { %2172 = vrcp.f32 %v1586_v26 }
 0x5b4   :  { %v2173_v27 = vpop.eup %2172 }
 0x5b5   :  { %1590 = vst.msk [vmem:[%s2532_s7] sm:$0x3] %vm1589_vm9, %v2173_v27 }

</bundles_post_ra>
